<compile_context>
chip_gen: v7x
topology: tpu7x:2x2x1
jax: 0.10.0
libtpu: 0.0.40
codegen_flags: <defaults>
</compile_context>

<pallas_src>
import functools

import jax
import jax.numpy as jnp
from jax.experimental import pallas as pl
from jax.experimental.pallas import tpu as pltpu


def _locked_dropout_kernel(mask_ref, x_ref, o_ref):
    """mask_ref: VMEM (1, BH); x_ref / o_ref: VMEM (tT, BH).

    Pure memory-bound broadcast multiply: out = x * mask (mask locked over T).
    """
    o_ref[...] = x_ref[...] * mask_ref[...]


def _choose_tile_rows(T, row_bytes):
    """Pick a T-tile: ~4 MiB per input buffer, multiple of 8, capped at 1024."""
    target = max(8, (4 << 20) // max(row_bytes, 1))
    tT = min(T, 1024, target)
    if tT < T:
        tT = max(8, (tT // 8) * 8)  # (8, 128) block rule when not covering full T
    return tT


def locked_dropout(x, seed, dropout=0.5, training=True):
    """JAX/Pallas equivalent of LockedDropout.forward(x, dropout).

    x: (T, B, H). One (B, H) mask is sampled per call and shared across T.
    """
    if (not training) or (not dropout):
        return x

    T, B, H = x.shape
    BH = B * H
    keep = 1.0 - float(dropout)

    # One mask per (batch, hidden) position, locked across the sequence axis.
    key = jax.random.PRNGKey(seed)
    bern = jax.random.bernoulli(key, p=keep, shape=(1, BH))
    # Values are exactly {0, 1/keep}; cast once to the input dtype so the
    # per-element multiply runs in x.dtype (native bf16 on v6e/v7x).
    mask = (bern.astype(jnp.float32) * (1.0 / keep)).astype(x.dtype)

    x2 = x.reshape(T, BH)  # lane-dense layout: full 128-lane rows, full sublanes

    itemsize = jnp.dtype(x.dtype).itemsize
    tT = _choose_tile_rows(T, BH * itemsize)
    grid = (pl.cdiv(T, tT),)

    # ~2 buffers x (input + output) tiles + mask + slack; clamped so it is
    # safe on v7x's smaller VMEM while still allowing large tiles.
    tile_bytes = tT * BH * itemsize
    vmem_limit = int(min(48 << 20, max(16 << 20, 6 * tile_bytes)))

    out2 = pl.pallas_call(
        _locked_dropout_kernel,
        out_shape=jax.ShapeDtypeStruct((T, BH), x.dtype),
        grid=grid,
        in_specs=[
            pl.BlockSpec((1, BH), lambda t: (0, 0)),   # same mask block every step
            pl.BlockSpec((tT, BH), lambda t: (t, 0)),  # tile over T
        ],
        out_specs=pl.BlockSpec((tT, BH), lambda t: (t, 0)),
        compiler_params=pltpu.CompilerParams(
            dimension_semantics=("parallel",),  # independent tiles -> both TCs on v7x
            vmem_limit_bytes=vmem_limit,
        ),
    )(mask, x2)

    return out2.reshape(T, B, H)


if __name__ == "__main__":
    # Small shapes implied by the forward: (seq=8, batch=2, hidden=128)
    key = jax.random.PRNGKey(0)
    x = jax.random.normal(key, (8, 2, 128), dtype=jnp.float32)

    dropout = 0.5
    out = locked_dropout(x, seed=1234, dropout=dropout, training=True)
    out = jax.block_until_ready(out)

    assert out.shape == x.shape

    # Per-element mask value (x is continuous random, so x != 0 a.s.).
    ratio = out / jnp.where(x == 0, 1.0, x)
    # Locked: identical mask at every time step.
    assert bool(jnp.all(jnp.abs(ratio - ratio[0:1]) < 1e-5))
    # Values are {0, 1/(1-p)}.
    scale = 1.0 / (1.0 - dropout)
    assert bool(jnp.all((jnp.abs(ratio) < 1e-5) | (jnp.abs(ratio - scale) < 1e-5)))

    # Eval mode / dropout=0 is the identity.
    out_eval = jax.block_until_ready(
        locked_dropout(x, seed=1234, dropout=dropout, training=False)
    )
    assert bool(jnp.all(out_eval == x))
    out_p0 = jax.block_until_ready(
        locked_dropout(x, seed=1234, dropout=0.0, training=True)
    )
    assert bool(jnp.all(out_p0 == x))

    print("KERNEL_OK")
</pallas_src>

<mosaic_0001>
module attributes {stable_mosaic.version = 11 : i64} {
  func.func @_locked_dropout_kernel(%arg0: i32, %arg1: memref<1x256xf32, #tpu.memory_space<vmem>>, %arg2: memref<8x256xf32, #tpu.memory_space<vmem>>, %arg3: memref<8x256xf32, #tpu.memory_space<vmem>>) attributes {dimension_semantics = [#tpu.dimension_semantics<parallel>], iteration_bounds = array<i64: 1>, scalar_prefetch = 0 : i64, scratch_operands = 0 : i64, tpu.core_type = #tpu.core_type<tc>, window_params = [{pipeline_mode = #tpu.pipeline_mode<synchronous>, transform_indices = @transform_0, window_bounds = array<i64: 1, 256>}, {transform_indices = @transform_1, window_bounds = array<i64: 8, 256>}, {transform_indices = @transform_2, window_bounds = array<i64: 8, 256>}]} {
    %c0 = arith.constant 0 : index
    %c0_0 = arith.constant 0 : index
    %0 = vector.load %arg2[%c0, %c0_0] : memref<8x256xf32, #tpu.memory_space<vmem>>, vector<8x256xf32>
    %c0_1 = arith.constant 0 : index
    %c0_2 = arith.constant 0 : index
    %1 = vector.load %arg1[%c0_1, %c0_2] : memref<1x256xf32, #tpu.memory_space<vmem>>, vector<1x256xf32>
    %2 = vector.broadcast %1 : vector<1x256xf32> to vector<8x256xf32>
    %3 = arith.mulf %0, %2 : vector<8x256xf32>
    %c0_3 = arith.constant 0 : index
    %c0_4 = arith.constant 0 : index
    %4 = vector.load %arg3[%c0_3, %c0_4] : memref<8x256xf32, #tpu.memory_space<vmem>>, vector<8x256xf32>
    tpu.vector_store %arg3[%c0_3, %c0_4], %3 {strides = array<i32>} : memref<8x256xf32, #tpu.memory_space<vmem>>, vector<8x256xf32>,
    return
  }
  func.func @transform_0(%arg0: i32) -> (i32, i32) {
    %c0_i32 = arith.constant 0 : i32
    %c0_i32_0 = arith.constant 0 : i32
    %c0_i32_1 = arith.constant 0 : i32
    return %c0_i32, %c0_i32_0 : i32, i32
  }
  func.func @transform_1(%arg0: i32) -> (i32, i32) {
    %c0_i32 = arith.constant 0 : i32
    %c0_i32_0 = arith.constant 0 : i32
    return %arg0, %c0_i32 : i32, i32
  }
  func.func @transform_2(%arg0: i32) -> (i32, i32) {
    %c0_i32 = arith.constant 0 : i32
    %c0_i32_0 = arith.constant 0 : i32
    return %arg0, %c0_i32 : i32, i32
  }
}

</mosaic_0001>

<bundles_post_ra>
// kernel: tpu_custom_call.1
= control target key start
LH: loop header
LB: loop body
LE: loop exit
PB: predicated region body
PF: predicated region fallthrough
CT: control target
= control target key end

     0   :  { %7 = vsyncpa [#allocation3], 0  ;;  %s199_s0 = inlined_call_operand.hbm [shape: f32[1,256], index: 0, kind: input, shape index: {}]   ;;  %s200_s1 = inlined_call_operand.hbm [shape: f32[8,256], index: 1, kind: input, shape index: {}]   ;;  %s201_s2 = inlined_call_operand.hbm [shape: f32[8,256], index: 2, kind: output, shape index: {}]  }
   0x1   :  { %8 = vsyncpa [#allocation6], 0 }
   0x2   :  { %9 = vsyncpa [#allocation4], 0  ;;  %s145_s9 = smov [#allocation2]   ;;  %s146_s11 = smov [#allocation5]  }
   0x3   :  { %s16_s10 = sshll.u32 %s145_s9, 4  ;;  %s26_s12 = sshll.u32 %s146_s11, 4  ;;  %s17_s10 = int_to_ptr.vmem [resolvable:$true] %s16_s10  ;;  %s27_s12 = int_to_ptr.vmem [resolvable:$true] %s26_s12 }
   0x4   :  { %s73_s15 = scalar_lea.hbm %s199_s0, 32 }
   0x5   :  { %p74_p0 = scmp.ne.s32.totalorder %s199_s0, %s73_s15  ;;  %p77_p1 = scmp.lt.u32.totalorder %s73_s15, %s199_s0 }
   0x7   :  { %p79_p2 = pnand %p77_p1, %p74_p0 }
   0x9   :  { %82 = shalt.err (!%p79_p2)
}
   0xa   :  { %s83_s20 = scalar_lea.vmem %s17_s10, 32  ;;  %p88_p4 = scmp.lt.s32.totalorder %s17_s10, %s17_s10 }
   0xb   :  { %p84_p3 = scmp.ne.s32.totalorder %s17_s10, %s83_s20  ;;  %p89_p5 = scmp.lt.s32.totalorder %s83_s20, %s83_s20 }
   0xd   :  { %p90_p6 = por %p89_p5, %p88_p4 }
   0xf   :  { %p91_p7 = pnand %p90_p6, %p84_p3 }
  0x11   :  { %94 = shalt.err (!%p91_p7)
}
  0x12   :  { %19 = dma.hbm_to_vmem [thread:$0]  %s199_s0, 32, %s17_s10, [#allocation3]  }
  0x13   :  { %s95_s25 = scalar_lea.hbm %s200_s1, 256 }
  0x14   :  { %p96_p8 = scmp.ne.s32.totalorder %s200_s1, %s95_s25  ;;  %p99_p9 = scmp.lt.u32.totalorder %s95_s25, %s200_s1 }
  0x16   :  { %p101_p10 = pnand %p99_p9, %p96_p8 }
  0x18   :  { %104 = shalt.err (!%p101_p10)
}
  0x19   :  { %s105_s30 = scalar_lea.vmem %s27_s12, 256  ;;  %p110_p12 = scmp.lt.s32.totalorder %s27_s12, %s27_s12 }
  0x1a   :  { %p106_p11 = scmp.ne.s32.totalorder %s27_s12, %s105_s30  ;;  %p111_p13 = scmp.lt.s32.totalorder %s105_s30, %s105_s30 }
  0x1c   :  { %p112_p0 = por %p111_p13, %p110_p12 }
  0x1e   :  { %p113_p1 = pnand %p112_p0, %p106_p11 }
  0x20   :  { %116 = shalt.err (!%p113_p1)
}
  0x21   :  { %29 = dma.hbm_to_vmem [thread:$0]  %s200_s1, 256, %s27_s12, [#allocation6]  }
  0x22   :  { %139 = dma.done.wait [#allocation3], 32  }
  0x23   :  { %140 = vsyncadd [#allocation3], 4294967264 }
  0x24   :  { %141 = dma.done.wait [#allocation6], 256  }
  0x25   :  { %142 = vsyncadd [#allocation6], 4294967040  ;;  %v40_v0 = vlaneseq  ;;  %v36_v4 = vld [vmem:[#allocation5] sm:$0xff]  ;;  %v38_v5 = vld [vmem:[#allocation2] sm:$0x3]  ;;  %s147_s4 = smov [#allocation7]  }
  0x26   :  { %v37_v6 = vld [vmem:[#allocation5 + $0x8] sm:$0xff]  ;;  %s60_s5 = sshll.u32 %s147_s4, 4  ;;  %s61_s5 = int_to_ptr.vmem [resolvable:$true] %s60_s5 }
  0x27   :  { %v41_v1 = vshrl.u32 %v40_v0, 7  ;;  %s117_s1 = scalar_lea.vmem %s61_s5, 256  ;;  %p122_p3 = scmp.lt.s32.totalorder %s61_s5, %s61_s5 }
  0x28   :  { %p118_p2 = scmp.ne.s32.totalorder %s61_s5, %s117_s1  ;;  %p123_p4 = scmp.lt.s32.totalorder %s117_s1, %s117_s1 }
  0x29   :  { %v42_v2 = vsub.s32 0, %v41_v1  ;;  %v46_v3 = vsub.s32 1, %v41_v1 }
  0x2a   :  { %p124_p5 = por %p123_p4, %p122_p3 }
  0x2b   :  { %v43_v7 = vrot.slane %v38_v5, %v42_v2  ;;  %v47_v8 = vrot.slane %v38_v5, %v46_v3 }
  0x2c   :  { %p125_p6 = pnand %p124_p5, %p118_p2 }
  0x2d   :  { %v50_v9 = vmul.f32 %v43_v7, %v36_v4  ;;  %v51_v10 = vmul.f32 %v47_v8, %v37_v6 }
  0x2f   :  { %52 = vst [vmem:[#allocation7] sm:$0xff] %v50_v9  ;;  %53 = vst [vmem:[#allocation7 + $0x8] sm:$0xff] %v51_v10 }
  0x30   :  { %128 = shalt.err (!%p125_p6)
}
  0x31   :  { %s129_s8 = scalar_lea.hbm %s201_s2, 256 }
  0x32   :  { %p130_p7 = scmp.ne.s32.totalorder %s201_s2, %s129_s8  ;;  %p133_p8 = scmp.lt.u32.totalorder %s129_s8, %s201_s2 }
  0x34   :  { %p135_p9 = pnand %p133_p8, %p130_p7 }
  0x36   :  { %138 = shalt.err (!%p135_p9)
}
  0x37   :  { %63 = dma.vmem_to_hbm [thread:$0]  %s61_s5, 256, %s201_s2, [#allocation4]  }
  0x38   :  { %143 = dma.done.wait [#allocation4], 256  }
  0x39   :  { %144 = vsyncadd [#allocation4], 4294967040 }
  0x3a   :  { %67 = vsyncpa [#allocation3], 1 }
  0x3b   :  { %68 = vsyncpa [#allocation6], 1 }
  0x3c   :  { %69 = vsyncpa [#allocation4], 1 }

</bundles_post_ra>
